<compile_context>
chip_gen: v6e
topology: v6e:2x2x1
jax: 0.10.0
libtpu: 0.0.40
codegen_flags: <defaults>
</compile_context>

<pallas_src>
import functools

import jax
import jax.numpy as jnp
from jax.experimental import pallas as pl
from jax.experimental.pallas import tpu as pltpu


def _round_up(n, m):
    return ((n + m - 1) // m) * m


def _dropout_kernel(x_ref, bits_ref, sel_ref, o_ref, *, p_zero):
    # x_ref   : VMEM (TR, C)  input rows
    # bits_ref: VMEM (TR, C)  uint32 random bits
    # sel_ref : VMEM (TR, 1)  per-row selection flag in {0.0, 1.0}
    # o_ref   : VMEM (TR, C)  output rows
    thresh = jnp.uint32(min(int(round(p_zero * (1 << 32))), (1 << 32) - 1))
    keep = (bits_ref[...] >= thresh).astype(jnp.float32)          # 1.0 = survive
    scale = jnp.float32(1.0 / (1.0 - p_zero))
    m = sel_ref[...]                                              # (TR, 1), broadcasts over C
    mult = (1.0 - m) + m * (scale * keep)                         # ==1 exactly when m==0
    o_ref[...] = (x_ref[...] * mult).astype(o_ref.dtype)


def dropout_aug(x, key, *, p_zero=0.2, p_sel=0.5, max_rows_per_block=512):
    """Pallas equivalent of the PyTorch Dropout augmentation forward pass."""
    B, L, C = x.shape
    R = B * L
    ksel, kbits = jax.random.split(key)

    # --- plain-JAX glue (parameter-free randomness, matching module semantics) ---
    # Per-sample selection flag: rand(B,1,1) < p_sel
    sel = jax.random.uniform(ksel, (B,)) < p_sel
    sel_rows = jnp.repeat(sel.astype(jnp.float32), L).reshape(R, 1)
    # Raw 32-bit draws for the elementwise dropout mask.
    bits = jax.random.bits(kbits, (R, C), dtype=jnp.uint32)

    x2 = x.reshape(R, C)

    # --- tiling: big lane-dense row blocks, padded to a multiple of the tile ---
    tr = min(max_rows_per_block, _round_up(R, 8))
    tr = max(8, (tr // 8) * 8)                     # sublane-aligned row tile
    R_pad = _round_up(R, tr)
    if R_pad != R:
        pad = R_pad - R
        x2 = jnp.pad(x2, ((0, pad), (0, 0)))
        bits = jnp.pad(bits, ((0, pad), (0, 0)))
        sel_rows = jnp.pad(sel_rows, ((0, pad), (0, 0)))

    kernel = functools.partial(_dropout_kernel, p_zero=float(p_zero))

    out2 = pl.pallas_call(
        kernel,
        out_shape=jax.ShapeDtypeStruct((R_pad, C), x.dtype),
        grid=(R_pad // tr,),
        in_specs=[
            pl.BlockSpec((tr, C), lambda i: (i, 0)),   # x rows
            pl.BlockSpec((tr, C), lambda i: (i, 0)),   # random bits
            pl.BlockSpec((tr, 1), lambda i: (i, 0)),   # per-row selection flag
        ],
        out_specs=pl.BlockSpec((tr, C), lambda i: (i, 0)),
        compiler_params=pltpu.CompilerParams(
            dimension_semantics=("parallel",),         # row tiles are independent
        ),
    )(x2, bits, sel_rows)

    return out2[:R].reshape(B, L, C)


if __name__ == "__main__":
    key = jax.random.PRNGKey(0)
    kx, kaug = jax.random.split(key)

    B, L, C = 4, 8, 128
    p_zero, p_sel = 0.2, 0.5
    x = jax.random.normal(kx, (B, L, C), dtype=jnp.float32)

    out = dropout_aug(x, kaug, p_zero=p_zero, p_sel=p_sel)
    out = jax.block_until_ready(out)

    # Reference computed with the exact same random draws the wrapper uses.
    ksel, kbits = jax.random.split(kaug)
    sel = jax.random.uniform(ksel, (B,)) < p_sel
    bits = jax.random.bits(kbits, (B * L, C), dtype=jnp.uint32).reshape(B, L, C)
    thresh = jnp.uint32(min(int(round(p_zero * (1 << 32))), (1 << 32) - 1))
    keep = bits >= thresh
    x_dropped = jnp.where(keep, x * (1.0 / (1.0 - p_zero)), 0.0)
    ref = jnp.where(sel[:, None, None], x_dropped, x)

    assert out.shape == x.shape and out.dtype == x.dtype
    assert jnp.allclose(out, ref, rtol=1e-6, atol=1e-6), "kernel mismatch vs reference"
    # Unselected samples must pass through bit-exactly.
    for b in range(B):
        if not bool(sel[b]):
            assert jnp.array_equal(out[b], x[b]), "unselected sample was modified"

    print("KERNEL_OK")
</pallas_src>

<mosaic_0001>
module attributes {stable_mosaic.version = 11 : i64} {
  func.func @_dropout_kernel(%arg0: i32, %arg1: memref<32x128xf32, #tpu.memory_space<vmem>>, %arg2: memref<32x128xi32, #tpu.memory_space<vmem>>, %arg3: memref<32x1xf32, #tpu.memory_space<vmem>>, %arg4: memref<32x128xf32, #tpu.memory_space<vmem>>) attributes {dimension_semantics = [#tpu.dimension_semantics<parallel>], iteration_bounds = array<i64: 1>, scalar_prefetch = 0 : i64, scratch_operands = 0 : i64, tpu.core_type = #tpu.core_type<tc>, window_params = [{transform_indices = @transform_0, window_bounds = array<i64: 32, 128>}, {transform_indices = @transform_1, window_bounds = array<i64: 32, 128>}, {transform_indices = @transform_2, window_bounds = array<i64: 32, 1>}, {transform_indices = @transform_3, window_bounds = array<i64: 32, 128>}]} {
    %c0 = arith.constant 0 : index
    %c0_0 = arith.constant 0 : index
    %0 = vector.load %arg2[%c0, %c0_0] : memref<32x128xi32, #tpu.memory_space<vmem>>, vector<32x128xi32>
    %c858993459_i32 = arith.constant 858993459 : i32
    %1 = vector.broadcast %c858993459_i32 : i32 to vector<32x128xi32>
    %2 = arith.cmpi uge, %0, %1 : vector<32x128xi32>
    %3 = arith.extui %2 : vector<32x128xi1> to vector<32x128xi32>
    %4 = arith.sitofp %3 : vector<32x128xi32> to vector<32x128xf32>
    %c0_1 = arith.constant 0 : index
    %c0_2 = arith.constant 0 : index
    %5 = vector.load %arg3[%c0_1, %c0_2] : memref<32x1xf32, #tpu.memory_space<vmem>>, vector<32x1xf32>
    %cst = arith.constant 1.000000e+00 : f32
    %6 = vector.broadcast %cst : f32 to vector<32x1xf32>
    %7 = arith.subf %6, %5 : vector<32x1xf32>
    %cst_3 = arith.constant 1.250000e+00 : f32
    %8 = vector.broadcast %cst_3 : f32 to vector<32x128xf32>
    %9 = arith.mulf %8, %4 : vector<32x128xf32>
    %10 = vector.broadcast %5 : vector<32x1xf32> to vector<32x128xf32>
    %11 = arith.mulf %10, %9 : vector<32x128xf32>
    %12 = vector.broadcast %7 : vector<32x1xf32> to vector<32x128xf32>
    %13 = arith.addf %12, %11 : vector<32x128xf32>
    %c0_4 = arith.constant 0 : index
    %c0_5 = arith.constant 0 : index
    %14 = vector.load %arg1[%c0_4, %c0_5] : memref<32x128xf32, #tpu.memory_space<vmem>>, vector<32x128xf32>
    %15 = arith.mulf %14, %13 : vector<32x128xf32>
    %c0_6 = arith.constant 0 : index
    %c0_7 = arith.constant 0 : index
    %16 = vector.load %arg4[%c0_6, %c0_7] : memref<32x128xf32, #tpu.memory_space<vmem>>, vector<32x128xf32>
    tpu.vector_store %arg4[%c0_6, %c0_7], %15 {strides = array<i32>} : memref<32x128xf32, #tpu.memory_space<vmem>>, vector<32x128xf32>,
    return
  }
  func.func @transform_0(%arg0: i32) -> (i32, i32) {
    %c0_i32 = arith.constant 0 : i32
    %c0_i32_0 = arith.constant 0 : i32
    return %arg0, %c0_i32 : i32, i32
  }
  func.func @transform_1(%arg0: i32) -> (i32, i32) {
    %c0_i32 = arith.constant 0 : i32
    %c0_i32_0 = arith.constant 0 : i32
    return %arg0, %c0_i32 : i32, i32
  }
  func.func @transform_2(%arg0: i32) -> (i32, i32) {
    %c0_i32 = arith.constant 0 : i32
    %c0_i32_0 = arith.constant 0 : i32
    return %arg0, %c0_i32 : i32, i32
  }
  func.func @transform_3(%arg0: i32) -> (i32, i32) {
    %c0_i32 = arith.constant 0 : i32
    %c0_i32_0 = arith.constant 0 : i32
    return %arg0, %c0_i32 : i32, i32
  }
}

</mosaic_0001>

<bundles_post_ra>
// kernel: tpu_custom_call.1
= control target key start
LH: loop header
LB: loop body
LE: loop exit
PB: predicated region body
PF: predicated region fallthrough
CT: control target
= control target key end

     0   :  { %8 = vsyncpa [#allocation3], 0  ;;  %s252_s0 = inlined_call_operand.vmem [shape: f32[32,128], index: 0, kind: input, shape index: {}]   ;;  %s253_s1 = inlined_call_operand.hbm [shape: u32[32,128], index: 1, kind: input, shape index: {}]   ;;  %s254_s2 = inlined_call_operand.vmem [shape: f32[32,1], index: 2, kind: input, shape index: {}]   ;;  %s255_s3 = inlined_call_operand.hbm [shape: f32[32,128], index: 3, kind: output, shape index: {}]  }
   0x1   :  { %9 = vsyncpa [#allocation4], 0  ;;  %s190_s12 = smov [#allocation2]  }
   0x2   :  { %s17_s13 = sshll.u32 %s190_s12, 4  ;;  %s18_s13 = int_to_ptr.vmem [resolvable:$true] %s17_s13 }
   0x3   :  { %s154_s14 = scalar_lea.vmem %s18_s13, 512  ;;  %p159_p1 = scmp.lt.s32.totalorder %s18_s13, %s18_s13 }
   0x4   :  { %p155_p0 = scmp.ne.s32.totalorder %s18_s13, %s154_s14  ;;  %p160_p2 = scmp.lt.s32.totalorder %s154_s14, %s154_s14 }
   0x6   :  { %p161_p3 = por %p160_p2, %p159_p1 }
   0x8   :  { %p162_p4 = pnand %p161_p3, %p155_p0 }
   0xa   :  { %165 = shalt.err (!%p162_p4)
}
   0xb   :  { %s191_s15 = smov 128   ;;  %s192_s16 = smov 8  }
   0xc   :  { %23 = dma.hbm_to_vmem [thread:$0]  %s253_s1, 512, %s18_s13, [#allocation3], %s191_s15, %s191_s15, %s192_s16  }
   0xd   :  { %186 = dma.done.wait [#allocation3], 512  }
   0xe   :  { %187 = vsyncadd [#allocation3], 4294966784  ;;  %v193_v0 = vmov 0   ;;  %v47_v1 = vld [vmem:[%s254_s2 + $0x10] sm:$0xff]  ;;  %v45_v2 = vld [vmem:[%s254_s2] sm:$0xff]  ;;  %v194_v15 = vmov 0.0  }
   0xf   :  { %145 = vset.pattern.permute.xlu1 %v193_v0  ;;  %144 = vset.pattern.permute.xlu0 %v193_v0  ;;  %v48_v3 = vld [vmem:[%s254_s2 + $0x18] sm:$0xff]  ;;  %v46_v4 = vld [vmem:[%s254_s2 + $0x8] sm:$0xff]  ;;  %v49_v5 = vsub.f32 1.0, %v45_v2  ;;  %v51_v7 = vsub.f32 1.0, %v47_v1  ;;  %v29_v9 = vld [vmem:[#allocation2] sm:$0xff]  ;;  %s195_s6 = smov [#allocation5]  }
  0x10   :  { %69 = vperm.xlu1 %145, %v47_v1   ;;  %59 = vperm.xlu0 %144, %v45_v2   ;;  %v50_v6 = vsub.f32 1.0, %v46_v4  ;;  %v52_v8 = vsub.f32 1.0, %v48_v3  ;;  %v30_v10 = vld [vmem:[#allocation2 + $0x8] sm:$0xff]  ;;  %vm33_vm0 = vcmp.ge.u32.totalorder %v29_v9, 858993459  ;;  %v31_v11 = vld [vmem:[#allocation2 + $0x10] sm:$0xff] }
  0x11   :  { %vm34_vm1 = vcmp.ge.u32.totalorder %v30_v10, 858993459  ;;  %v32_v12 = vld [vmem:[#allocation2 + $0x18] sm:$0xff]  ;;  %v134_v16 = vsel %vm33_vm0, 1.0, %v194_v15  ;;  %vm35_vm2 = vcmp.ge.u32.totalorder %v31_v11, 858993459 }
  0x12   :  { %v135_v17 = vsel %vm34_vm1, 1.0, %v194_v15  ;;  %vm36_vm3 = vcmp.ge.u32.totalorder %v32_v12, 858993459  ;;  %v53_v18 = vmul.f32 1.25, %v134_v16  ;;  %v136_v20 = vsel %vm35_vm2, 1.0, %v194_v15  ;;  %v106_v28 = vld [vmem:[%s252_s0 + $0x8] sm:$0xff] }
  0x13   :  { %v54_v19 = vmul.f32 1.25, %v135_v17  ;;  %v137_v22 = vsel %vm36_vm3, 1.0, %v194_v15  ;;  %v55_v24 = vmul.f32 1.25, %v136_v20  ;;  %v105_v30 = vld [vmem:[%s252_s0] sm:$0xff]  ;;  %v108_v38 = vld [vmem:[%s252_s0 + $0x18] sm:$0xff]  ;;  %v107_v40 = vld [vmem:[%s252_s0 + $0x10] sm:$0xff] }
  0x14   :  { %74 = vperm.xlu1 %145, %v48_v3   ;;  %64 = vperm.xlu0 %144, %v46_v4   ;;  %v56_v26 = vmul.f32 1.25, %v137_v22  ;;  %s122_s7 = sshll.u32 %s195_s6, 4  ;;  %s123_s7 = int_to_ptr.vmem [resolvable:$true] %s122_s7 }
  0x15   :  { %s166_s8 = scalar_lea.vmem %s123_s7, 512  ;;  %p171_p6 = scmp.lt.s32.totalorder %s123_s7, %s123_s7 }
  0x16   :  { %p167_p5 = scmp.ne.s32.totalorder %s123_s7, %s166_s8  ;;  %p172_p7 = scmp.lt.s32.totalorder %s166_s8, %s166_s8 }
  0x18   :  { %88 = vperm.xlu1 %145, %v50_v6   ;;  %83 = vperm.xlu0 %144, %v49_v5   ;;  %p173_p8 = por %p172_p7, %p171_p6 }
  0x1a   :  { %p174_p9 = pnand %p173_p8, %p167_p5 }
  0x1c   :  { %98 = vperm.xlu1 %145, %v52_v8   ;;  %93 = vperm.xlu0 %144, %v51_v7  }
  0x8b   :  { %v70_v13 = vpop.permute.xlu1 %69  ;;  %v60_v14 = vpop.permute.xlu0 %59 }
  0x8c   :  { %v77_v25 = vmul.f32 %v60_v14, %v53_v18  ;;  %v79_v34 = vmul.f32 %v70_v13, %v55_v24 }
  0x8f   :  { %v75_v21 = vpop.permute.xlu1 %74  ;;  %v65_v23 = vpop.permute.xlu0 %64 }
  0x90   :  { %v78_v27 = vmul.f32 %v65_v23, %v54_v19  ;;  %v80_v35 = vmul.f32 %v75_v21, %v56_v26 }
  0x93   :  { %v89_v29 = vpop.permute.xlu1 %88  ;;  %v84_v31 = vpop.permute.xlu0 %83 }
  0x94   :  { %v102_v32 = vadd.f32 %v89_v29, %v78_v27  ;;  %v101_v33 = vadd.f32 %v84_v31, %v77_v25 }
  0x96   :  { %v110_v36 = vmul.f32 %v106_v28, %v102_v32  ;;  %v109_v37 = vmul.f32 %v105_v30, %v101_v33 }
  0x97   :  { %v99_v39 = vpop.permute.xlu1 %98  ;;  %v94_v41 = vpop.permute.xlu0 %93 }
  0x98   :  { %114 = vst [vmem:[#allocation5 + $0x8] sm:$0xff] %v110_v36  ;;  %113 = vst [vmem:[#allocation5] sm:$0xff] %v109_v37  ;;  %v104_v42 = vadd.f32 %v99_v39, %v80_v35  ;;  %v103_v43 = vadd.f32 %v94_v41, %v79_v34 }
  0x9a   :  { %v112_v44 = vmul.f32 %v108_v38, %v104_v42  ;;  %v111_v45 = vmul.f32 %v107_v40, %v103_v43 }
  0x9c   :  { %116 = vst [vmem:[#allocation5 + $0x18] sm:$0xff] %v112_v44  ;;  %115 = vst [vmem:[#allocation5 + $0x10] sm:$0xff] %v111_v45 }
  0x9d   :  { %177 = shalt.err (!%p174_p9)
}
  0x9e   :  { %128 = dma.vmem_to_hbm [thread:$0]  %s123_s7, 512, %s255_s3, [#allocation4], %s191_s15, %s191_s15, %s192_s16  }
  0x9f   :  { %188 = dma.done.wait [#allocation4], 512  }
  0xa0   :  { %189 = vsyncadd [#allocation4], 4294966784 }
  0xa1   :  { %132 = vsyncpa [#allocation3], 1 }
  0xa2   :  { %133 = vsyncpa [#allocation4], 1 }

</bundles_post_ra>
